<compile_context>
chip_gen: v5e
topology: v5e:2x2
jax: 0.10.0
libtpu: 0.0.40
codegen_flags: <defaults>
</compile_context>

<pallas_src>
import jax
import jax.numpy as jnp
from jax.experimental import pallas as pl
from jax.experimental.pallas import tpu as pltpu


def _round_up(x: int, m: int) -> int:
    return ((x + m - 1) // m) * m


def _vmem_capacity_bytes() -> int:
    """Per-TensorCore VMEM capacity (generation-aware), with a safe fallback."""
    try:
        info = pltpu.get_tpu_info()
        cap = getattr(info, "vmem_capacity_bytes", None)
        if cap:
            return int(cap)
    except Exception:
        pass
    return 64 << 20  # conservative fallback: v7x per-TC VMEM


def _vmem_needed(tb: int, tn: int, rank: int, ent_isz: int, out_isz: int) -> int:
    ent = 2 * rank * tn * ent_isz       # double-buffered streamed entity tile
    out = 2 * tb * tn * out_isz         # double-buffered score output tile
    qry = 2 * 2 * tb * rank * 4         # double-buffered lhs / rel tiles (f32)
    return ent + out + qry


def _choose_tiles(n_entities: int, batch_pad: int, rank: int,
                  ent_isz: int, out_isz: int, vmem_cap: int):
    """Pick (tb, tn): rank-aware entity tile, >=4/even entity steps, VMEM-capped."""
    # Entity tile: ~2 MiB of streamed table per buffer.
    target_bytes = 2 << 20
    tn = max(128, (target_bytes // max(rank * ent_isz, 1)) // 128 * 128)
    tn = min(tn, _round_up(n_entities, 128))
    # v7x megacore: keep >= 4 entity grid steps when the table allows it.
    if n_entities > 4 * 128:
        tn = min(tn, max(128, _round_up(pl.cdiv(n_entities, 4), 128)))
    # Prefer an even number of entity steps so neither core idles on the tail.
    steps = pl.cdiv(n_entities, tn)
    if steps > 1 and steps % 2 == 1:
        tn = max(128, _round_up(pl.cdiv(n_entities, steps + 1), 128))

    # Batch tile.
    tb = min(_round_up(max(batch_pad, 1), 8), 256)

    # Shrink to the generation-aware VMEM budget (leave room for Mosaic scratch).
    budget = int(vmem_cap * 0.6)
    while _vmem_needed(tb, tn, rank, ent_isz, out_isz) > budget and tn > 128:
        tn = max(128, _round_up(tn // 2, 128))
    while _vmem_needed(tb, tn, rank, ent_isz, out_isz) > budget and tb > 8:
        tb = max(8, _round_up(tb // 2, 8))
    return tb, tn


def _dismult_kernel(lhs_ref, rel_ref, ent_ref, out_ref):
    # lhs_ref, rel_ref: (TB, rank) f32 batch tile of query embeddings
    # ent_ref:          (rank, TN) bf16 tile of the pre-transposed entity table
    # out_ref:          (TB, TN) tile of the score matrix
    q = (lhs_ref[...] * rel_ref[...]).astype(ent_ref.dtype)   # VPU + pack to bf16
    # Plain (B,K)x(K,N) contraction: RHS already in native MXU orientation.
    out_ref[...] = jax.lax.dot_general(
        q, ent_ref[...],
        dimension_numbers=(((1,), (0,)), ((), ())),
        preferred_element_type=jnp.float32,
    ).astype(out_ref.dtype)


def dismult_scores(lhs, rel, ent_weight_t, *, out_dtype=jnp.float32):
    """scores = (lhs * rel) @ ent_weight_t, tiled over (entities, batch).

    lhs, rel:      (B, rank) float32 query embeddings
    ent_weight_t:  (rank, N) pre-transposed entity table (ideally bfloat16)
    out_dtype:     score dtype (f32 by default; bf16 halves writeback traffic
                   for large batches if the consumer tolerates it)
    """
    B, rank = lhs.shape
    rank2, N = ent_weight_t.shape
    assert rank == rank2

    ent_isz = jnp.dtype(ent_weight_t.dtype).itemsize
    out_isz = jnp.dtype(out_dtype).itemsize
    vmem_cap = _vmem_capacity_bytes()

    B8 = _round_up(max(B, 1), 8)
    tb, tn = _choose_tiles(N, B8, rank, ent_isz, out_isz, vmem_cap)

    # Zero-pad batch to a tb multiple and entities to a tn multiple.
    B_pad = _round_up(B8, tb)
    N_pad = _round_up(N, tn)
    if B_pad != B:
        lhs = jnp.pad(lhs, ((0, B_pad - B), (0, 0)))
        rel = jnp.pad(rel, ((0, B_pad - B), (0, 0)))
    if N_pad != N:
        ent_weight_t = jnp.pad(ent_weight_t, ((0, 0), (0, N_pad - N)))

    # Entity tiles on the outer axis, batch tiles inner: the streamed entity
    # tile's block index is constant across the inner axis -> fetched once per
    # outer step and reused for every batch tile.
    grid = (N_pad // tn, B_pad // tb)

    needed = _vmem_needed(tb, tn, rank, ent_isz, out_isz)
    headroom = max(4 << 20, needed // 8)
    vmem_limit = int(min(max(needed + headroom, 32 << 20), int(vmem_cap * 0.9)))

    cost = pl.CostEstimate(
        flops=2 * B_pad * rank * N_pad,
        transcendentals=0,
        bytes_accessed=(rank * N_pad * ent_isz        # entity stream
                        + B_pad * N_pad * out_isz     # score writeback
                        + 2 * B_pad * rank * 4),      # lhs / rel reads
    )

    scores = pl.pallas_call(
        _dismult_kernel,
        out_shape=jax.ShapeDtypeStruct((B_pad, N_pad), out_dtype),
        grid_spec=pltpu.PrefetchScalarGridSpec(
            num_scalar_prefetch=0,
            grid=grid,
            in_specs=[
                pl.BlockSpec((tb, rank), lambda j, b: (b, 0)),    # lhs tile
                pl.BlockSpec((tb, rank), lambda j, b: (b, 0)),    # rel tile
                pl.BlockSpec((rank, tn), lambda j, b: (0, j)),    # entity tile
            ],
            out_specs=pl.BlockSpec((tb, tn), lambda j, b: (b, j)),
        ),
        compiler_params=pltpu.CompilerParams(
            dimension_semantics=("parallel", "parallel"),
            vmem_limit_bytes=vmem_limit,
        ),
        cost_estimate=cost,
    )(lhs, rel, ent_weight_t)

    return scores[:B, :N]


class DisMultPallas:
    """JAX/Pallas port of the DisMult module's forward pass."""

    def __init__(self, sizes, rank, init_size=0.001, key=None):
        if key is None:
            key = jax.random.PRNGKey(0)
        k_ent, k_rel = jax.random.split(key)
        n_ent, n_rel = sizes[0], sizes[1]
        # nn.Embedding default init ~ N(0, 1), scaled by init_size for
        # embeddings[0] (entities) and embeddings[1] (relations).
        self.ent_weight = (jax.random.normal(k_ent, (n_ent, rank), jnp.float32)
                           * init_size)
        self.rel_weight = (jax.random.normal(k_rel, (n_rel, rank), jnp.float32)
                           * init_size)
        # Pre-transposed bf16 scoring copy (rank, N): built once offline, it
        # halves the HBM traffic of the bandwidth-bound score matmul and gives
        # the MXU its RHS in (K, N) orientation without per-step transposes.
        # TODO(synk): if the entity embeddings are trained/updated, this bf16
        # scoring copy must be refreshed (it is a one-time snapshot).
        self.ent_weight_score_t = jnp.asarray(self.ent_weight.T,
                                              dtype=jnp.bfloat16)
        self.rank = rank

    def forward(self, x):
        # x: (B, 3) int32 triples (lhs_idx, rel_idx, rhs_idx)
        lhs = jnp.take(self.ent_weight, x[:, 0], axis=0)
        rel = jnp.take(self.rel_weight, x[:, 1], axis=0)
        rhs = jnp.take(self.ent_weight, x[:, 2], axis=0)
        scores = dismult_scores(lhs, rel, self.ent_weight_score_t)
        return scores, [(lhs, rel, rhs)]


if __name__ == "__main__":
    key = jax.random.PRNGKey(0)
    k_model, k_q = jax.random.split(key)

    n_entities, n_relations, rank = 256, 16, 128
    batch = 8

    model = DisMultPallas(sizes=(n_entities, n_relations, n_entities),
                          rank=rank, init_size=0.001, key=k_model)

    # deterministic small query batch
    k_h, k_r, k_t = jax.random.split(k_q, 3)
    queries = jnp.stack([
        jax.random.randint(k_h, (batch,), 0, n_entities),
        jax.random.randint(k_r, (batch,), 0, n_relations),
        jax.random.randint(k_t, (batch,), 0, n_entities),
    ], axis=1).astype(jnp.int32)                       # (B, 3)

    scores, (factors,) = model.forward(queries)
    scores = jax.block_until_ready(scores)
    assert scores.shape == (batch, n_entities)

    lhs, rel, rhs = factors
    # Cross-check against a pure-JAX reference on the same bf16 scoring path.
    q_bf16 = (lhs * rel).astype(jnp.bfloat16)
    ref = jnp.dot(q_bf16, model.ent_weight_score_t,
                  preferred_element_type=jnp.float32)
    assert jnp.allclose(scores, ref, rtol=1e-2, atol=1e-6)

    # Sanity vs. full-f32 math (differs only by bf16 table rounding).
    ref_f32 = (lhs * rel) @ model.ent_weight.T
    assert jnp.allclose(scores, ref_f32, rtol=3e-2, atol=2e-6)

    # Stand-alone numeric check at O(1) magnitudes (also exercises padding:
    # batch of 5 is not a sublane multiple).
    kx, kw = jax.random.split(k_q)
    xq = jax.random.normal(kx, (5, rank), jnp.float32)
    xr = jax.random.normal(kw, (5, rank), jnp.float32)
    got = jax.block_until_ready(
        dismult_scores(xq, xr, model.ent_weight_score_t))
    want = jnp.dot((xq * xr).astype(jnp.bfloat16), model.ent_weight_score_t,
                   preferred_element_type=jnp.float32)
    assert got.shape == (5, n_entities)
    assert jnp.allclose(got, want, rtol=2e-2, atol=1e-4)

    print("KERNEL_OK")
</pallas_src>

<mosaic_0001>
module attributes {stable_mosaic.version = 11 : i64} {
  func.func @_dismult_kernel(%arg0: i32, %arg1: i32, %arg2: memref<8x128xf32, #tpu.memory_space<vmem>>, %arg3: memref<8x128xf32, #tpu.memory_space<vmem>>, %arg4: memref<128x256xbf16, #tpu.memory_space<vmem>>, %arg5: memref<8x256xf32, #tpu.memory_space<vmem>>) attributes {dimension_semantics = [#tpu.dimension_semantics<parallel>, #tpu.dimension_semantics<parallel>], iteration_bounds = array<i64: 1, 1>, scalar_prefetch = 0 : i64, scratch_operands = 0 : i64, tpu.core_type = #tpu.core_type<tc>, window_params = [{transform_indices = @transform_0, window_bounds = array<i64: 8, 128>}, {transform_indices = @transform_1, window_bounds = array<i64: 8, 128>}, {transform_indices = @transform_2, window_bounds = array<i64: 128, 256>}, {transform_indices = @transform_3, window_bounds = array<i64: 8, 256>}]} {
    %c0 = arith.constant 0 : index
    %c0_0 = arith.constant 0 : index
    %0 = vector.load %arg2[%c0, %c0_0] : memref<8x128xf32, #tpu.memory_space<vmem>>, vector<8x128xf32>
    %c0_1 = arith.constant 0 : index
    %c0_2 = arith.constant 0 : index
    %1 = vector.load %arg3[%c0_1, %c0_2] : memref<8x128xf32, #tpu.memory_space<vmem>>, vector<8x128xf32>
    %2 = arith.mulf %0, %1 : vector<8x128xf32>
    %3 = arith.truncf %2 : vector<8x128xf32> to vector<8x128xbf16>
    %c0_3 = arith.constant 0 : index
    %c0_4 = arith.constant 0 : index
    %4 = vector.load %arg4[%c0_3, %c0_4] : memref<128x256xbf16, #tpu.memory_space<vmem>>, vector<128x256xbf16>
    %cst = arith.constant dense<0.000000e+00> : vector<8x256xf32>
    %5 = tpu.matmul %3, %4, %cst {dimension_numbers = #tpu.dot_dimension_numbers<[1], [0], [0], [1], [0, 0, 1, 1], [], []>} : vector<8x128xbf16>, vector<128x256xbf16>, vector<8x256xf32> -> vector<8x256xf32>
    %c0_5 = arith.constant 0 : index
    %c0_6 = arith.constant 0 : index
    %6 = vector.load %arg5[%c0_5, %c0_6] : memref<8x256xf32, #tpu.memory_space<vmem>>, vector<8x256xf32>
    tpu.vector_store %arg5[%c0_5, %c0_6], %5 {strides = array<i32>} : memref<8x256xf32, #tpu.memory_space<vmem>>, vector<8x256xf32>,
    return
  }
  func.func @transform_0(%arg0: i32, %arg1: i32) -> (i32, i32) {
    %c0_i32 = arith.constant 0 : i32
    %c0_i32_0 = arith.constant 0 : i32
    return %arg1, %c0_i32 : i32, i32
  }
  func.func @transform_1(%arg0: i32, %arg1: i32) -> (i32, i32) {
    %c0_i32 = arith.constant 0 : i32
    %c0_i32_0 = arith.constant 0 : i32
    return %arg1, %c0_i32 : i32, i32
  }
  func.func @transform_2(%arg0: i32, %arg1: i32) -> (i32, i32) {
    %c0_i32 = arith.constant 0 : i32
    %c0_i32_0 = arith.constant 0 : i32
    return %c0_i32, %arg0 : i32, i32
  }
  func.func @transform_3(%arg0: i32, %arg1: i32) -> (i32, i32) {
    %c0_i32 = arith.constant 0 : i32
    return %arg1, %arg0 : i32, i32
  }
}

</mosaic_0001>

<bundles_post_ra>
// kernel: tpu_custom_call.1
= control target key start
LH: loop header
LB: loop body
LE: loop exit
PB: predicated region body
PF: predicated region fallthrough
CT: control target
= control target key end

     0   :  { %8 = vsyncpa [#allocation3], 0  ;;  %s430_s0 = inlined_call_operand.hbm [shape: f32[8,128], index: 0, kind: input, shape index: {}]   ;;  %s431_s1 = inlined_call_operand.hbm [shape: f32[8,128], index: 1, kind: input, shape index: {}]   ;;  %s432_s2 = inlined_call_operand.hbm [shape: bf16[128,256], index: 2, kind: input, shape index: {}]   ;;  %s433_s3 = inlined_call_operand.hbm [shape: f32[8,256], index: 3, kind: output, shape index: {}]  }
   0x1   :  { %9 = vsyncpa [#allocation6], 0  ;;  %s27_s14 = sshll.u32 %s431_s1, 4  ;;  %s28_s14 = int_to_ptr.hbm [resolvable:$true] %s27_s14 }
   0x2   :  { %10 = vsyncpa [#allocation4], 0  ;;  %s392_s15 = smov [#allocation5]   ;;  %s16_s19 = sshll.u32 %s430_s0, 4  ;;  %s17_s19 = int_to_ptr.hbm [resolvable:$true] %s16_s19 }
   0x3   :  { %s29_s16 = sshll.u32 %s392_s15, 4  ;;  %s393_s20 = smov [#allocation2]   ;;  %s30_s16 = int_to_ptr.vmem [resolvable:$true] %s29_s16 }
   0x4   :  { %32 = dma.hbm_to_vmem [thread:$0]  %s28_s14, 128, %s30_s16, [#allocation6]  }
   0x5   :  { %s18_s21 = sshll.u32 %s393_s20, 4  ;;  %s37_s24 = sshll.u32 %s432_s2, 4  ;;  %s19_s21 = int_to_ptr.vmem [resolvable:$true] %s18_s21  ;;  %s38_s24 = int_to_ptr.hbm [resolvable:$true] %s37_s24 }
   0x6   :  { %21 = dma.hbm_to_vmem [thread:$0]  %s17_s19, 128, %s19_s21, [#allocation3]  }
   0x7   :  { %s394_s1 = smov [#allocation7]   ;;  %s395_s26 = smov 128  }
   0x8   :  { %s39_s25 = sshll.u32 %s394_s1, 4  ;;  %s396_s27 = smov 8   ;;  %s40_s25 = int_to_ptr.vmem [resolvable:$true] %s39_s25 }
   0x9   :  { %45 = dma.hbm_to_vmem [thread:$0]  %s38_s24, 2048, %s40_s25, [#allocation6], %s395_s26, %s395_s26, %s396_s27  }
   0xa   :  { %386 = dma.done.wait [#allocation3], 128  }
   0xb   :  { %387 = vsyncadd [#allocation3], 4294967168 }
   0xc   :  { %388 = dma.done.wait [#allocation6], 2176  }
   0xd   :  { %389 = vsyncadd [#allocation6], 4294965120  ;;  %v262_v0 = vld [vmem:[#allocation7 + $0x70] sm:$0xf]  ;;  %v283_v1 = vld [vmem:[#allocation7 + $0x74] sm:$0xf0] }
   0xe   :  { %v282_v2 = vld [vmem:[#allocation7 + $0x74] sm:$0xf]  ;;  %v263_v3 = vor.u32 %v283_v1, %v262_v0  ;;  %v264_v4 = vld [vmem:[#allocation7 + $0x78] sm:$0xf0]  ;;  %v254_v5 = vld [vmem:[#allocation7 + $0x60] sm:$0xf] }
   0xf   :  { %v281_v6 = vld [vmem:[#allocation7 + $0x64] sm:$0xf0]  ;;  %v267_v7 = vor.u32 %v282_v2, %v264_v4  ;;  %v280_v8 = vld [vmem:[#allocation7 + $0x64] sm:$0xf]  ;;  %v256_v9 = vld [vmem:[#allocation7 + $0x68] sm:$0xf0] }
  0x10   :  { %158 = vmatpush.bf16.msra.mxu0 %v263_v3  ;;  %v255_v10 = vor.u32 %v281_v6, %v254_v5  ;;  %v259_v11 = vor.u32 %v280_v8, %v256_v9  ;;  %v246_v12 = vld [vmem:[#allocation7 + $0x50] sm:$0xf]  ;;  %v279_v13 = vld [vmem:[#allocation7 + $0x54] sm:$0xf0]  ;;  %v278_v14 = vld [vmem:[#allocation7 + $0x54] sm:$0xf] }
  0x11   :  { %171 = vmatpush.bf16.msra.mxu1 %v267_v7  ;;  %v248_v15 = vld [vmem:[#allocation7 + $0x58] sm:$0xf0]  ;;  %v247_v16 = vor.u32 %v279_v13, %v246_v12  ;;  %v238_v18 = vld [vmem:[#allocation7 + $0x40] sm:$0xf]  ;;  %v277_v19 = vld [vmem:[#allocation7 + $0x44] sm:$0xf0] }
  0x12   :  { %v251_v17 = vor.u32 %v278_v14, %v248_v15  ;;  %v276_v20 = vld [vmem:[#allocation7 + $0x44] sm:$0xf]  ;;  %v240_v21 = vld [vmem:[#allocation7 + $0x48] sm:$0xf0]  ;;  %v239_v22 = vor.u32 %v277_v19, %v238_v18  ;;  %v230_v24 = vld [vmem:[#allocation7 + $0x30] sm:$0xf] }
  0x13   :  { %v243_v23 = vor.u32 %v276_v20, %v240_v21  ;;  %v275_v25 = vld [vmem:[#allocation7 + $0x34] sm:$0xf0]  ;;  %v274_v26 = vld [vmem:[#allocation7 + $0x34] sm:$0xf]  ;;  %v232_v27 = vld [vmem:[#allocation7 + $0x38] sm:$0xf0] }
  0x14   :  { %159 = vmatpush.bf16.msra.mxu0 %v255_v10  ;;  %v231_v28 = vor.u32 %v275_v25, %v230_v24  ;;  %v235_v29 = vor.u32 %v274_v26, %v232_v27  ;;  %v222_v30 = vld [vmem:[#allocation7 + $0x20] sm:$0xf]  ;;  %v273_v31 = vld [vmem:[#allocation7 + $0x24] sm:$0xf0]  ;;  %v272_v32 = vld [vmem:[#allocation7 + $0x24] sm:$0xf] }
  0x15   :  { %172 = vmatpush.bf16.msra.mxu1 %v259_v11  ;;  %v224_v33 = vld [vmem:[#allocation7 + $0x28] sm:$0xf0]  ;;  %v223_v34 = vor.u32 %v273_v31, %v222_v30  ;;  %v214_v36 = vld [vmem:[#allocation7 + $0x10] sm:$0xf]  ;;  %v271_v37 = vld [vmem:[#allocation7 + $0x14] sm:$0xf0] }
  0x16   :  { %v227_v35 = vor.u32 %v272_v32, %v224_v33  ;;  %v270_v38 = vld [vmem:[#allocation7 + $0x14] sm:$0xf]  ;;  %v216_v39 = vld [vmem:[#allocation7 + $0x18] sm:$0xf0]  ;;  %v215_v40 = vor.u32 %v271_v37, %v214_v36  ;;  %v206_v44 = vld [vmem:[#allocation7] sm:$0xf] }
  0x17   :  { %v58_v41 = vld [vmem:[#allocation2] sm:$0xff]  ;;  %v59_v42 = vld [vmem:[#allocation5] sm:$0xff]  ;;  %v219_v43 = vor.u32 %v270_v38, %v216_v39  ;;  %v269_v45 = vld [vmem:[#allocation7 + $0x4] sm:$0xf0]  ;;  %s397_s0 = smov [#allocation8]   ;;  %s193_s30 = sshll.u32 %s433_s3, 4  ;;  %s194_s30 = int_to_ptr.hbm [resolvable:$true] %s193_s30 }
  0x18   :  { %160 = vmatpush.bf16.msra.mxu0 %v247_v16  ;;  %v268_v46 = vld [vmem:[#allocation7 + $0x4] sm:$0xf]  ;;  %v208_v47 = vld [vmem:[#allocation7 + $0x8] sm:$0xf0]  ;;  %v60_v48 = vmul.f32 %v59_v42, %v58_v41  ;;  %v207_v49 = vor.u32 %v269_v45, %v206_v44  ;;  %s191_s2 = sshll.u32 %s397_s0, 4  ;;  %s192_s2 = int_to_ptr.vmem [resolvable:$true] %s191_s2 }
  0x19   :  { %173 = vmatpush.bf16.msra.mxu1 %v251_v17  ;;  %v211_v50 = vor.u32 %v268_v46, %v208_v47 }
  0x1a   :  { %v61_v51 = vpack.c.bf16 %v60_v48, %v60_v48 }
  0x1c   :  { %161 = vmatpush.bf16.msra.mxu0 %v239_v22 }
  0x1d   :  { %174 = vmatpush.bf16.msra.mxu1 %v243_v23 }
  0x20   :  { %162 = vmatpush.bf16.msra.mxu0 %v231_v28 }
  0x21   :  { %175 = vmatpush.bf16.msra.mxu1 %v235_v29 }
  0x24   :  { %163 = vmatpush.bf16.msra.mxu0 %v223_v34 }
  0x25   :  { %176 = vmatpush.bf16.msra.mxu1 %v227_v35 }
  0x28   :  { %164 = vmatpush.bf16.msra.mxu0 %v215_v40 }
  0x29   :  { %177 = vmatpush.bf16.msra.mxu1 %v219_v43 }
  0x2c   :  { %165 = vmatpush.bf16.msra.mxu0 %v207_v49 }
  0x2d   :  { %178 = vmatpush.bf16.msra.mxu1 %v211_v50 }
  0x2f   :  { %166 = vmatmul.bf16.vlgmr.msra.gmra.mxu0 %v61_v51 }
  0x30   :  { %179 = vmatmul.bf16.vlgmr.msra.gmra.mxu1 %v61_v51 }
  0xac   :  { %v167_v52 = vpop.f32.mrf.mxu0 }
  0xad   :  { %184 = vst [vmem:[#allocation8] sm:$0xff] %v167_v52  ;;  %v180_v53 = vpop.f32.mrf.mxu1 }
  0xae   :  { %185 = vst [vmem:[#allocation8 + $0x8] sm:$0xff] %v180_v53 }
  0xaf   :  { %196 = dma.vmem_to_hbm [thread:$0]  %s192_s2, 256, %s194_s30, [#allocation4]  }
  0xb4   :  { %v169_v54 = vpop.f32.mrf.mxu0 }
  0xb5   :  { %v182_v55 = vpop.f32.mrf.mxu1 }
  0xb6   :  { %390 = dma.done.wait [#allocation4], 256  }
  0xb7   :  { %391 = vsyncadd [#allocation4], 4294967040 }
  0xb8   :  { %201 = vsyncpa [#allocation3], 1 }
  0xb9   :  { %202 = vsyncpa [#allocation6], 1 }
  0xba   :  { %203 = vsyncpa [#allocation4], 1 }

</bundles_post_ra>
